<compile_context>
chip_gen: v6e
topology: v6e:2x2x1
jax: 0.10.0
libtpu: 0.0.40
codegen_flags: <defaults>
</compile_context>

<pallas_src>
import functools

import jax
import jax.numpy as jnp
from jax.experimental import pallas as pl
from jax.experimental.pallas import tpu as pltpu

_LANE = 128  # TPU vreg lane width


def _round_up(x, m):
    return (x + m - 1) // m * m


def _vmem_capacity_bytes():
    """Physical per-core VMEM (generation-aware); conservative fallback."""
    try:
        return int(pltpu.get_tpu_info().vmem_capacity_bytes)
    except Exception:
        return 64 * 1024 * 1024  # v7x physical VMEM per core (smallest current gen)


def _has_bf16_elementwise():
    """bf16 VPU/EUP exists on v6e/v7x; v5e lacks it (keep f32 elementwise there)."""
    try:
        kind = jax.devices()[0].device_kind.lower()
    except Exception:
        return True
    return not ("v5 lite" in kind or "v5lite" in kind or "v5e" in kind)


def _pick_b_block(B, T, E, Q, in_itemsize, out_itemsize, sizing_budget_bytes):
    """Largest batch tile whose double-buffered I/O + f32 intermediates fit VMEM."""
    cisz = 4  # f32 compute / accumulation, worst case
    per_row = 2 * (T * E + Q + E) * in_itemsize        # double-buffered input blocks
    per_row += 2 * 2 * _LANE * out_itemsize            # two lane-padded outputs, 2x buffered
    per_row += 4 * T * E * cisz                        # tanh out + product temporaries (f32)
    per_row += 4 * _LANE * cisz                        # small (b,T)/(b,E) temps, lane-padded
    fixed = 4 * 1024 * 1024 + Q * E * in_itemsize      # Wa weights + compiler scratch slack
    cap = max(int((sizing_budget_bytes - fixed) // per_row), 8)

    # Keep >= 2 grid steps once the batch is large: lets the "parallel" batch axis
    # shard across v7x's two TensorCores and gives the pipeline something to
    # overlap.  Harmless (~0.35 us extra) on single-TC v5e/v6e.
    if B >= 256:
        cap = min(cap, pl.cdiv(B, 2))

    if cap >= B:
        return B                                       # one block covering the whole batch
    b_block = (cap // 8) * 8                           # sublane alignment when block < B
    if b_block >= 256:
        b_block = (b_block // 128) * 128               # keep packed bf16/int8 layouts clean
    return max(b_block, 8)


def _store_lane_padded(ref, values):
    """Dense full-lane-width store: zero-pad `values` up to the ref's lane width.

    Writing a 128-wide slab keeps the store an unmasked vst and the output DMA
    dense; the wrapper slices the real columns back out.
    """
    pad = ref.shape[-1] - values.shape[-1]
    if pad:
        zeros = jnp.zeros(values.shape[:-1] + (pad,), values.dtype)
        values = jnp.concatenate([values, zeros], axis=-1)
    ref[...] = values.astype(ref.dtype)


def _attention_kernel(lh_ref, wa_t_ref, enc_ref, va_ref, exp_ref, sc_ref,
                      *, bf16_elementwise):
    f32 = jnp.float32

    # Wa projection on the (otherwise idle) MXU: (b, Q) @ (Q, E) -> (b, E), f32 acc.
    a = jnp.dot(lh_ref[...], wa_t_ref[...], preferred_element_type=f32)

    enc = enc_ref[...]                                   # (b, T, E), native dtype
    va = va_ref[...]                                     # (b, E)

    # Elementwise dtype: bf16 on chips with a bf16 VPU/EUP (2x packed throughput,
    # half the vreg/VMEM intermediate footprint); f32 otherwise.  All reductions
    # accumulate in f32.
    cdt = jnp.bfloat16 if bf16_elementwise else f32

    out = jnp.tanh(a.astype(cdt)[:, None, :] + enc.astype(cdt))           # (b, T, E)

    # energies[b, t] = <out[b, t, :], va[b, :]>.  E is tiny, so contract on the
    # VPU (multiply) + XLU (lane reduce) with f32 accumulation instead of a
    # near-empty MXU pass.
    energies = jnp.sum((out * va.astype(cdt)[:, None, :]).astype(f32), axis=-1)  # (b, T)

    # Numerically-stable softmax over time; exact normalization (the divide only
    # touches a (b, T) slab, so exactness is essentially free).
    m = jnp.max(energies, axis=-1, keepdims=True)
    e = jnp.exp(energies - m)
    scores = e / jnp.sum(e, axis=-1, keepdims=True)                        # (b, T), f32

    # expectation[b, :] = sum_t scores[b, t] * enc[b, t, :]  (M=1 per row, so a
    # VPU multiply + sublane reduce with f32 accumulation beats an MXU matvec).
    expectation = jnp.sum((scores.astype(cdt)[:, :, None] * enc).astype(f32), axis=1)

    # Lane-dense (128-wide) output stores; wrapper slices the valid columns.
    _store_lane_padded(exp_ref, expectation)
    _store_lane_padded(sc_ref, scores)


def vanilla_attention(last_hidden, encoder_outputs, wa_weight, va, *, b_block=None):
    """last_hidden (B, Q), encoder_outputs (B, T, E), wa_weight (E, Q), va (B, E)."""
    B, T, E = encoder_outputs.shape
    Q = last_hidden.shape[1]
    out_dtype = encoder_outputs.dtype

    # Pre-transposed weight so the in-kernel projection is a plain NN matmul.
    wa_t = wa_weight.T.astype(last_hidden.dtype)                 # (Q, E)

    # Generation-aware VMEM budgeting: raise the scoped-VMEM limit to ~75% of the
    # physical capacity (96 MiB on v5e/v6e, 48 MiB on v7x) and size tiles against
    # ~85% of that limit to leave slack for compiler-internal scratch.
    physical_vmem = _vmem_capacity_bytes()
    vmem_limit = (physical_vmem * 3) // 4
    sizing_budget = (vmem_limit * 85) // 100

    if b_block is None:
        b_block = _pick_b_block(
            B, T, E, Q,
            jnp.dtype(encoder_outputs.dtype).itemsize,
            jnp.dtype(out_dtype).itemsize,
            sizing_budget,
        )
    b_block = min(int(b_block), B)
    if b_block < B:
        b_block = max((b_block // 8) * 8, 8)

    n_blocks = pl.cdiv(B, b_block)        # partial tail block handled by masking
    e_pad = max(_round_up(E, _LANE), _LANE)
    t_pad = max(_round_up(T, _LANE), _LANE)

    use_bf16 = (encoder_outputs.dtype == jnp.bfloat16) and _has_bf16_elementwise()
    kernel = functools.partial(_attention_kernel, bf16_elementwise=use_bf16)

    exp_pad, sc_pad = pl.pallas_call(
        kernel,
        out_shape=(
            jax.ShapeDtypeStruct((B, e_pad), out_dtype),
            jax.ShapeDtypeStruct((B, t_pad), out_dtype),
        ),
        grid_spec=pltpu.PrefetchScalarGridSpec(
            num_scalar_prefetch=0,
            grid=(n_blocks,),
            in_specs=[
                pl.BlockSpec((b_block, Q), lambda i: (i, 0)),         # last_hidden
                pl.BlockSpec((Q, E), lambda i: (0, 0)),               # Wa^T (grid-invariant)
                pl.BlockSpec((b_block, T, E), lambda i: (i, 0, 0)),   # encoder_outputs
                pl.BlockSpec((b_block, E), lambda i: (i, 0)),         # va
            ],
            out_specs=[
                pl.BlockSpec((b_block, e_pad), lambda i: (i, 0)),     # expectations (padded)
                pl.BlockSpec((b_block, t_pad), lambda i: (i, 0)),     # scores (padded)
            ],
        ),
        compiler_params=pltpu.CompilerParams(
            dimension_semantics=("parallel",),
            vmem_limit_bytes=int(vmem_limit),
        ),
    )(last_hidden, wa_t, encoder_outputs, va)

    return exp_pad[:, :E], sc_pad[:, :T]


def _reference(last_hidden, encoder_outputs, wa_weight, va):
    # Pure-JAX replica of the PyTorch forward (bahdanau, mlp=False).
    a = last_hidden @ wa_weight.T                               # (B, E)
    out = jnp.tanh(a[:, None, :] + encoder_outputs)             # (B, T, E)
    energies = jnp.einsum("bte,be->bt", out, va)                # (B, T)
    scores = jax.nn.softmax(energies, axis=-1)                  # (B, T)
    expectations = jnp.einsum("bt,bte->be", scores, encoder_outputs)
    return expectations, scores


if __name__ == "__main__":
    # hparams: encoder_embedding_dim (Q) = 32, E = 32, batch_size = 2, max_time = 8
    B, T, Q, E = 2, 8, 32, 32

    key = jax.random.PRNGKey(0)
    k1, k2, k3, k4 = jax.random.split(key, 4)
    last_hidden = jax.random.normal(k1, (B, Q), dtype=jnp.float32)
    encoder_outputs = jax.random.normal(k2, (B, T, E), dtype=jnp.float32)
    # Deterministic synthetic parameters (not a checkpoint):
    wa_weight = jax.random.normal(k3, (E, Q), dtype=jnp.float32) * (1.0 / jnp.sqrt(Q))
    va = jax.random.normal(k4, (B, E), dtype=jnp.float32) * 0.1   # nn.init.normal_(va, 0, 0.1)

    exp_k, sc_k = vanilla_attention(last_hidden, encoder_outputs, wa_weight, va)
    exp_k = jax.block_until_ready(exp_k)
    sc_k = jax.block_until_ready(sc_k)

    exp_r, sc_r = _reference(last_hidden, encoder_outputs, wa_weight, va)

    assert exp_k.shape == (B, E) and sc_k.shape == (B, T)
    # Tolerance covers the in-kernel MXU projection possibly using a different
    # f32 pass count than XLA's reference dot (softmax itself is exact now).
    assert jnp.allclose(exp_k, exp_r, atol=5e-3, rtol=5e-3)
    assert jnp.allclose(sc_k, sc_r, atol=5e-3, rtol=5e-3)

    print("KERNEL_OK")
</pallas_src>

<mosaic_0001>
module attributes {stable_mosaic.version = 11 : i64} {
  func.func @_attention_kernel(%arg0: i32, %arg1: memref<2x32xf32, #tpu.memory_space<vmem>>, %arg2: memref<32x32xf32, #tpu.memory_space<vmem>>, %arg3: memref<2x8x32xf32, #tpu.memory_space<vmem>>, %arg4: memref<2x32xf32, #tpu.memory_space<vmem>>, %arg5: memref<2x128xf32, #tpu.memory_space<vmem>>, %arg6: memref<2x128xf32, #tpu.memory_space<vmem>>) attributes {dimension_semantics = [#tpu.dimension_semantics<parallel>], iteration_bounds = array<i64: 1>, scalar_prefetch = 0 : i64, scratch_operands = 0 : i64, tpu.core_type = #tpu.core_type<tc>, window_params = [{transform_indices = @transform_0, window_bounds = array<i64: 2, 32>}, {pipeline_mode = #tpu.pipeline_mode<synchronous>, transform_indices = @transform_1, window_bounds = array<i64: 32, 32>}, {transform_indices = @transform_2, window_bounds = array<i64: 2, 8, 32>}, {transform_indices = @transform_3, window_bounds = array<i64: 2, 32>}, {transform_indices = @transform_4, window_bounds = array<i64: 2, 128>}, {transform_indices = @transform_5, window_bounds = array<i64: 2, 128>}]} {
    %c0 = arith.constant 0 : index
    %c0_0 = arith.constant 0 : index
    %0 = vector.load %arg1[%c0, %c0_0] : memref<2x32xf32, #tpu.memory_space<vmem>>, vector<2x32xf32>
    %c0_1 = arith.constant 0 : index
    %c0_2 = arith.constant 0 : index
    %1 = vector.load %arg2[%c0_1, %c0_2] : memref<32x32xf32, #tpu.memory_space<vmem>>, vector<32x32xf32>
    %cst = arith.constant dense<0.000000e+00> : vector<2x32xf32>
    %2 = tpu.matmul %0, %1, %cst {dimension_numbers = #tpu.dot_dimension_numbers<[1], [0], [0], [1], [0, 0, 1, 1], [], []>} : vector<2x32xf32>, vector<32x32xf32>, vector<2x32xf32> -> vector<2x32xf32>
    %c0_3 = arith.constant 0 : index
    %c0_4 = arith.constant 0 : index
    %c0_5 = arith.constant 0 : index
    %3 = vector.load %arg3[%c0_3, %c0_4, %c0_5] : memref<2x8x32xf32, #tpu.memory_space<vmem>>, vector<2x8x32xf32>
    %c0_6 = arith.constant 0 : index
    %c0_7 = arith.constant 0 : index
    %4 = vector.load %arg4[%c0_6, %c0_7] : memref<2x32xf32, #tpu.memory_space<vmem>>, vector<2x32xf32>
    %5 = vector.shape_cast %2 : vector<2x32xf32> to vector<2x1x32xf32>
    %6 = vector.broadcast %5 : vector<2x1x32xf32> to vector<2x8x32xf32>
    %7 = arith.addf %6, %3 : vector<2x8x32xf32>
    %8 = math.tanh %7 : vector<2x8x32xf32>
    %9 = vector.shape_cast %4 : vector<2x32xf32> to vector<2x1x32xf32>
    %10 = vector.broadcast %9 : vector<2x1x32xf32> to vector<2x8x32xf32>
    %11 = arith.mulf %8, %10 : vector<2x8x32xf32>
    %cst_8 = arith.constant dense<0.000000e+00> : vector<2x8xf32>
    %12 = vector.multi_reduction <add>, %11, %cst_8 [2] : vector<2x8x32xf32> to vector<2x8xf32>
    %cst_9 = arith.constant dense<0xFF800000> : vector<2xf32>
    %13 = vector.multi_reduction <maximumf>, %12, %cst_9 [1] : vector<2x8xf32> to vector<2xf32>
    %14 = vector.shape_cast %13 : vector<2xf32> to vector<2x1xf32>
    %15 = vector.broadcast %14 : vector<2x1xf32> to vector<2x8xf32>
    %16 = arith.subf %12, %15 : vector<2x8xf32>
    %17 = math.exp %16 : vector<2x8xf32>
    %cst_10 = arith.constant dense<0.000000e+00> : vector<2xf32>
    %18 = vector.multi_reduction <add>, %17, %cst_10 [1] : vector<2x8xf32> to vector<2xf32>
    %19 = vector.shape_cast %18 : vector<2xf32> to vector<2x1xf32>
    %20 = vector.broadcast %19 : vector<2x1xf32> to vector<2x8xf32>
    %21 = arith.divf %17, %20 : vector<2x8xf32>
    %22 = vector.shape_cast %21 : vector<2x8xf32> to vector<2x8x1xf32>
    %23 = vector.broadcast %22 : vector<2x8x1xf32> to vector<2x8x32xf32>
    %24 = arith.mulf %23, %3 : vector<2x8x32xf32>
    %cst_11 = arith.constant dense<0.000000e+00> : vector<2x32xf32>
    %25 = vector.multi_reduction <add>, %24, %cst_11 [1] : vector<2x8x32xf32> to vector<2x32xf32>
    %cst_12 = arith.constant 0.000000e+00 : f32
    %26 = vector.broadcast %cst_12 : f32 to vector<2x96xf32>
    %27 = tpu.concatenate %25, %26 in 1 : vector<2x32xf32>, vector<2x96xf32> -> vector<2x128xf32>
    %c0_13 = arith.constant 0 : index
    %c0_14 = arith.constant 0 : index
    %28 = vector.load %arg5[%c0_13, %c0_14] : memref<2x128xf32, #tpu.memory_space<vmem>>, vector<2x128xf32>
    tpu.vector_store %arg5[%c0_13, %c0_14], %27 {strides = array<i32>} : memref<2x128xf32, #tpu.memory_space<vmem>>, vector<2x128xf32>,
    %cst_15 = arith.constant 0.000000e+00 : f32
    %29 = vector.broadcast %cst_15 : f32 to vector<2x120xf32>
    %30 = tpu.concatenate %21, %29 in 1 : vector<2x8xf32>, vector<2x120xf32> -> vector<2x128xf32>
    %c0_16 = arith.constant 0 : index
    %c0_17 = arith.constant 0 : index
    %31 = vector.load %arg6[%c0_16, %c0_17] : memref<2x128xf32, #tpu.memory_space<vmem>>, vector<2x128xf32>
    tpu.vector_store %arg6[%c0_16, %c0_17], %30 {strides = array<i32>} : memref<2x128xf32, #tpu.memory_space<vmem>>, vector<2x128xf32>,
    return
  }
  func.func @transform_0(%arg0: i32) -> (i32, i32) {
    %c0_i32 = arith.constant 0 : i32
    %c0_i32_0 = arith.constant 0 : i32
    return %arg0, %c0_i32 : i32, i32
  }
  func.func @transform_1(%arg0: i32) -> (i32, i32) {
    %c0_i32 = arith.constant 0 : i32
    %c0_i32_0 = arith.constant 0 : i32
    %c0_i32_1 = arith.constant 0 : i32
    return %c0_i32, %c0_i32_0 : i32, i32
  }
  func.func @transform_2(%arg0: i32) -> (i32, i32, i32) {
    %c0_i32 = arith.constant 0 : i32
    %c0_i32_0 = arith.constant 0 : i32
    %c0_i32_1 = arith.constant 0 : i32
    return %arg0, %c0_i32, %c0_i32_0 : i32, i32, i32
  }
  func.func @transform_3(%arg0: i32) -> (i32, i32) {
    %c0_i32 = arith.constant 0 : i32
    %c0_i32_0 = arith.constant 0 : i32
    return %arg0, %c0_i32 : i32, i32
  }
  func.func @transform_4(%arg0: i32) -> (i32, i32) {
    %c0_i32 = arith.constant 0 : i32
    %c0_i32_0 = arith.constant 0 : i32
    return %arg0, %c0_i32 : i32, i32
  }
  func.func @transform_5(%arg0: i32) -> (i32, i32) {
    %c0_i32 = arith.constant 0 : i32
    %c0_i32_0 = arith.constant 0 : i32
    return %arg0, %c0_i32 : i32, i32
  }
}

</mosaic_0001>

<bundles_post_ra>
// kernel: tpu_custom_call.1
= control target key start
LH: loop header
LB: loop body
LE: loop exit
PB: predicated region body
PF: predicated region fallthrough
CT: control target
= control target key end

     0   :  { %11 = vsyncpa [#allocation3], 0  ;;  %s611_s0 = inlined_call_operand.hbm [shape: f32[2,32], index: 0, kind: input, shape index: {}]   ;;  %s612_s1 = inlined_call_operand.hbm [shape: f32[32,32], index: 1, kind: input, shape index: {}]   ;;  %s613_s2 = inlined_call_operand.hbm [shape: f32[2,8,32], index: 2, kind: input, shape index: {}]   ;;  %s614_s3 = inlined_call_operand.vmem [shape: f32[2,32], index: 3, kind: input, shape index: {}]   ;;  %s615_s4 = inlined_call_operand.hbm [shape: f32[2,128], index: 4, kind: output, shape index: {0}]   ;;  %s616_s5 = inlined_call_operand.hbm [shape: f32[2,128], index: 5, kind: output, shape index: {1}]  }
   0x1   :  { %12 = vsyncpa [#allocation6], 0 }
   0x2   :  { %13 = vsyncpa [#allocation4], 0 }
   0x3   :  { %14 = vsyncpa [#allocation10], 0  ;;  %s518_s18 = smov [#allocation5]  }
   0x4   :  { %s30_s19 = sshll.u32 %s518_s18, 4  ;;  %s31_s19 = int_to_ptr.vmem [resolvable:$true] %s30_s19 }
   0x5   :  { %s418_s20 = scalar_lea.vmem %s31_s19, 512  ;;  %p423_p1 = scmp.lt.s32.totalorder %s31_s19, %s31_s19 }
   0x6   :  { %p419_p0 = scmp.ne.s32.totalorder %s31_s19, %s418_s20  ;;  %p424_p2 = scmp.lt.s32.totalorder %s418_s20, %s418_s20 }
   0x8   :  { %p425_p3 = por %p424_p2, %p423_p1 }
   0xa   :  { %p426_p4 = pnand %p425_p3, %p419_p0 }
   0xc   :  { %429 = shalt.err (!%p426_p4)
}
   0xd   :  { %s519_s21 = smov 128   ;;  %s520_s22 = smov 8  }
   0xe   :  { %36 = dma.hbm_to_vmem [thread:$0]  %s612_s1, 512, %s31_s19, [#allocation6], %s519_s21, %s519_s21, %s520_s22  }
   0xf   :  { %s521_s25 = smov [#allocation2]   ;;  %s522_s27 = smov [#allocation7]  }
  0x10   :  { %s21_s26 = sshll.u32 %s521_s25, 4  ;;  %s42_s28 = sshll.u32 %s522_s27, 4  ;;  %s22_s26 = int_to_ptr.vmem [resolvable:$true] %s21_s26  ;;  %s43_s28 = int_to_ptr.vmem [resolvable:$true] %s42_s28 }
  0x11   :  { %s438_s29 = scalar_lea.vmem %s22_s26, 32  ;;  %p443_p6 = scmp.lt.s32.totalorder %s22_s26, %s22_s26 }
  0x12   :  { %p439_p5 = scmp.ne.s32.totalorder %s22_s26, %s438_s29  ;;  %p444_p7 = scmp.lt.s32.totalorder %s438_s29, %s438_s29 }
  0x14   :  { %p445_p8 = por %p444_p7, %p443_p6 }
  0x16   :  { %p446_p9 = pnand %p445_p8, %p439_p5 }
  0x18   :  { %449 = shalt.err (!%p446_p9)
}
  0x19   :  { %24 = dma.hbm_to_vmem [thread:$0]  %s611_s0, 32, %s22_s26, [#allocation3]  }
  0x1a   :  { %s458_s7 = scalar_lea.vmem %s43_s28, 256  ;;  %p463_p11 = scmp.lt.s32.totalorder %s43_s28, %s43_s28 }
  0x1b   :  { %p459_p10 = scmp.ne.s32.totalorder %s43_s28, %s458_s7  ;;  %p464_p12 = scmp.lt.s32.totalorder %s458_s7, %s458_s7 }
  0x1d   :  { %p465_p13 = por %p464_p12, %p463_p11 }
  0x1f   :  { %p466_p0 = pnand %p465_p13, %p459_p10 }
  0x21   :  { %469 = shalt.err (!%p466_p0)
}
  0x22   :  { %48 = dma.hbm_to_vmem [thread:$0]  %s613_s2, 256, %s43_s28, [#allocation6], %s519_s21, %s519_s21, %s520_s22  }
  0x23   :  { %510 = dma.done.wait [#allocation3], 32  }
  0x24   :  { %511 = vsyncadd [#allocation3], 4294967264 }
  0x25   :  { %512 = dma.done.wait [#allocation6], 768  }
  0x26   :  { %513 = vsyncadd [#allocation6], 4294966528  ;;  %v523_v0 = vmov 0.0   ;;  %vm524_vm0 = vmmov 0   ;;  %v64_v1 = vld [vmem:[#allocation5 + $0x18] sm:$0xff]  ;;  %v63_v2 = vld [vmem:[#allocation5 + $0x10] sm:$0xff]  ;;  %v146_v8 = vlaneseq }
  0x27   :  { %374 = vmatprep.subr.mxu0 %v523_v0  ;;  %382 = vmatprep.mubr.msk.f32.mxu0 %vm524_vm0, %v523_v0  ;;  %v62_v3 = vld [vmem:[#allocation5 + $0x8] sm:$0xff]  ;;  %v61_v4 = vld [vmem:[#allocation5] sm:$0xff]  ;;  %v60_v5 = vld [vmem:[#allocation2] sm:$0x3]  ;;  %vm65_vm1 = vcmask 261120   ;;  %vm232_vm2 = vcmask 1041409  }
  0x28   :  { %375 = vmatpush3.msra.mxu0 %v64_v1  ;;  %v525_v6 = vmov 1966171168   ;;  %v569_v10 = vshrl.u32 %v146_v8, 7  ;;  %v575_v18 = vld [vmem:[#allocation7] sm:$0xff]  ;;  %v578_v21 = vld [vmem:[#allocation7 + $0x8] sm:$0xff]  ;;  %v223_v37 = vand.u32 127, %v146_v8 }
  0x29   :  { %376 = vmatprep.subr.mxu0 %v523_v0  ;;  %v144_v7 = vunpack.c.l.s4 %v525_v6  ;;  %v368_v25 = vld.sshfl [vmem:[%s614_s3] sm:$0x11 pattern:$0x75316420]  ;;  %vm235_vm3 = vcmask 58368   ;;  %v526_v45 = vmov 0  }
  0x2a   :  { %377 = vmatpush3.msra.mxu0 %v63_v2  ;;  %v573_v14 = vsub.s32 0, %v569_v10  ;;  %v187_v26 = vcombine.high %v368_v25, %v368_v25  ;;  %v226_v39 = vsub.s32 %v223_v37, %v569_v10  ;;  %397 = vset.pattern.permute.xlu0 %v526_v45  ;;  %v246_v46 = vsub.s32 1, %v569_v10  ;;  %s527_s3 = smov [#allocation9]  }
  0x2b   :  { %378 = vmatprep.subr.mxu0 %v523_v0  ;;  %v145_v9 = vunpack.c.0.s8 %v144_v7  ;;  %396 = vset.pattern.permute.xlu1 %v526_v45  ;;  %s353_s9 = sshll.u32 %s527_s3, 4  ;;  %vm334_vm4 = vcmask 64512   ;;  %s354_s9 = int_to_ptr.vmem [resolvable:$true] %s353_s9 }
  0x2c   :  { %379 = vmatpush3.msra.mxu0 %v62_v3  ;;  %s470_s10 = scalar_lea.vmem %s354_s9, 32  ;;  %p475_p2 = scmp.lt.s32.totalorder %s354_s9, %s354_s9 }
  0x2d   :  { %380 = vmatprep.subr.mxu0 %v523_v0  ;;  %v148_v11 = vsub.s32 %v145_v9, %v569_v10  ;;  %p471_p1 = scmp.ne.s32.totalorder %s354_s9, %s470_s10  ;;  %p476_p3 = scmp.lt.s32.totalorder %s470_s10, %s470_s10 }
  0x2e   :  { %381 = vmatpush3.msra.mxu0 %v61_v4 }
  0x2f   :  { %383 = vmatmul.mubr.msk.f32.vlgmr.msra.gmra.mxu0 %vm65_vm1, %v60_v5  ;;  %v194_v27 = vrot.slane %v368_v25, %v148_v11  ;;  %v201_v28 = vrot.slane %v187_v26, %v148_v11  ;;  %p477_p4 = por %p476_p3, %p475_p2 }
  0x31   :  { %v205_v29 = vrot.slane %v194_v27, %v573_v14  ;;  %v209_v30 = vrot.slane %v201_v28, %v573_v14  ;;  %p478_p5 = pnand %p477_p4, %p471_p1 }
  0xef   :  { %v135_v12 = vpop.f32.mrf.mxu0 }
  0xf0   :  { %v149_v13 = vrot.slane %v135_v12, %v148_v11 }
  0xf1   :  { %v384_v15 = vpop.f32.mrf.mxu0 }
  0xf2   :  { %v150_v16 = vcombine.high %v149_v13, %v149_v13  ;;  %v157_v17 = vrot.slane %v149_v13, %v148_v11 }
  0xf4   :  { %v164_v19 = vrot.slane %v150_v16, %v148_v11  ;;  %v168_v20 = vrot.slane %v157_v17, %v573_v14 }
  0xf6   :  { %v172_v22 = vrot.slane %v164_v19, %v573_v14  ;;  %v175_v23 = vadd.f32 %v168_v20, %v575_v18 }
  0xf8   :  { %v176_v24 = vadd.f32 %v172_v22, %v578_v21  ;;  %398 = vtanh.f32 %v175_v23 }
  0xfa   :  { %400 = vtanh.f32 %v176_v24 }
 0x105   :  { %v399_v31 = vpop.eup %398 }
 0x106   :  { %v212_v32 = vmul.f32 %v399_v31, %v205_v29 }
 0x107   :  { %v401_v33 = vpop.eup %400 }
 0x108   :  { %v214_v34 = vsel %vm65_vm1, %v212_v32, 0.0  ;;  %v213_v35 = vmul.f32 %v401_v33, %v209_v30 }
 0x109   :  { %215 = vadd.xlane.f32.xlu0 %v214_v34 }
 0x10a   :  { %v217_v36 = vsel %vm65_vm1, %v213_v35, 0.0 }
 0x10d   :  { %218 = vadd.xlane.f32.xlu0 %v217_v36 }
 0x192   :  { %v216_v38 = vpop.xlane.xlu0 %215 }
 0x193   :  { %v227_v41 = vrot.slane %v216_v38, %v226_v39 }
 0x196   :  { %v219_v40 = vpop.xlane.xlu0 %218 }
 0x197   :  { %v231_v42 = vrot.slane %v219_v40, %v226_v39 }
 0x199   :  { %v233_v43 = vsel %vm232_vm2, %v231_v42, %v227_v41 }
 0x19a   :  { %v236_v44 = vsel %vm235_vm3, %v233_v43, -inf }
 0x19b   :  { %237 = vmax.xlane.f32.xlu1 %v236_v44 }
 0x224   :  { %v238_v47 = vpop.xlane.xlu1 %237 }
 0x225   :  { %v243_v48 = vrot.slane %v238_v47, %v573_v14  ;;  %v247_v49 = vrot.slane %v238_v47, %v246_v46 }
 0x227   :  { %v250_v50 = vsub.f32 %v216_v38, %v243_v48  ;;  %v251_v51 = vsub.f32 %v219_v40, %v247_v49 }
 0x229   :  { %v252_v52 = vmul.f32 1.442695, %v250_v50  ;;  %v254_v53 = vmul.f32 1.442695, %v251_v51 }
 0x22b   :  { %402 = vpow2.f32 %v252_v52 }
 0x22c   :  { %404 = vpow2.f32 %v254_v53 }
 0x238   :  { %v403_v54 = vpop.eup %402 }
 0x239   :  { %v405_v55 = vpop.eup %404  ;;  %259 = vperm.xlu1 %396, %v403_v54  }
 0x23a   :  { %262 = vperm.xlu0 %397, %v405_v55  }
 0x2b4   :  { %v260_v56 = vpop.permute.xlu1 %259 }
 0x2b5   :  { %v263_v57 = vpop.permute.xlu0 %262  ;;  %v267_v58 = vrot.slane %v260_v56, %v226_v39 }
 0x2b6   :  { %v271_v59 = vrot.slane %v263_v57, %v226_v39 }
 0x2b8   :  { %v272_v60 = vsel %vm232_vm2, %v271_v59, %v267_v58 }
 0x2b9   :  { %v274_v61 = vsel %vm235_vm3, %v272_v60, 0.0 }
 0x2ba   :  { %275 = vadd.xlane.f32.xlu1 %v274_v61 }
 0x343   :  { %v276_v62 = vpop.xlane.xlu1 %275 }
 0x344   :  { %v281_v63 = vrot.slane %v276_v62, %v573_v14  ;;  %v285_v0 = vrot.slane %v276_v62, %v246_v46 }
 0x346   :  { %406 = vrcp.f32 %v281_v63 }
 0x347   :  { %408 = vrcp.f32 %v285_v0 }
 0x353   :  { %v407_v1 = vpop.eup %406 }
 0x354   :  { %v289_v2 = vmul.f32 %v407_v1, %v403_v54  ;;  %v409_v3 = vpop.eup %408 }
 0x355   :  { %v291_v4 = vmul.f32 %v409_v3, %v405_v55 }
 0x356   :  { %294 = vperm.xlu0 %397, %v289_v2  }
 0x35a   :  { %299 = vperm.xlu0 %397, %v291_v4  }
 0x3d1   :  { %v295_v5 = vpop.permute.xlu0 %294 }
 0x3d2   :  { %v302_v6 = vmul.f32 %v295_v5, %v575_v18  ;;  %v327_v10 = vrot.slane %v295_v5, %v226_v39 }
 0x3d4   :  { %v304_v7 = vsel %vm65_vm1, %v302_v6, 0.0 }
 0x3d5   :  { %v305_v8 = vrot.slane %v304_v7, 4  ;;  %v300_v9 = vpop.permute.xlu0 %299 }
 0x3d6   :  { %v303_v11 = vmul.f32 %v300_v9, %v578_v21  ;;  %v331_v12 = vrot.slane %v300_v9, %v226_v39 }
 0x3d7   :  { %v306_v13 = vadd.f32 %v305_v8, %v304_v7 }
 0x3d8   :  { %v311_v14 = vsel %vm65_vm1, %v303_v11, 0.0  ;;  %v332_v15 = vsel %vm232_vm2, %v331_v12, %v327_v10 }
 0x3d9   :  { %v307_v16 = vrot.slane %v306_v13, 2  ;;  %v312_v17 = vrot.slane %v311_v14, 4  ;;  %v335_v18 = vsel %vm334_vm4, %v332_v15, 0.0 }
 0x3da   :  { %336 = vst [vmem:[#allocation9] sm:$0x3] %v335_v18 }
 0x3db   :  { %v308_v19 = vadd.f32 %v307_v16, %v306_v13  ;;  %v313_v20 = vadd.f32 %v312_v17, %v311_v14 }
 0x3dc   :  { %481 = shalt.err (!%p478_p5)
}
 0x3dd   :  { %356 = dma.vmem_to_hbm [thread:$0]  %s354_s9, 32, %s616_s5, [#allocation10]   ;;  %v314_v21 = vrot.slane %v313_v20, 2  ;;  %v309_v22 = vrot.slane %v308_v19, 1 }
 0x3de   :  { %s528_s13 = smov [#allocation8]  }
 0x3df   :  { %v315_v23 = vadd.f32 %v314_v21, %v313_v20  ;;  %s343_s14 = sshll.u32 %s528_s13, 4  ;;  %v310_v26 = vadd.f32 %v309_v22, %v308_v19  ;;  %s344_s14 = int_to_ptr.vmem [resolvable:$true] %s343_s14 }
 0x3e0   :  { %s490_s15 = scalar_lea.vmem %s344_s14, 32  ;;  %p495_p7 = scmp.lt.s32.totalorder %s344_s14, %s344_s14 }
 0x3e1   :  { %v316_v24 = vrot.slane %v315_v23, 1  ;;  %p491_p6 = scmp.ne.s32.totalorder %s344_s14, %s490_s15  ;;  %p496_p8 = scmp.lt.s32.totalorder %s490_s15, %s490_s15 }
 0x3e3   :  { %v317_v25 = vadd.f32 %v316_v24, %v315_v23  ;;  %p497_p9 = por %p496_p8, %p495_p7 }
 0x3e5   :  { %v320_v27 = vsel %vm232_vm2, %v317_v25, %v310_v26  ;;  %p498_p10 = pnand %p497_p9, %p491_p6 }
 0x3e6   :  { %v322_v28 = vsel %vm65_vm1, %v320_v27, 0.0 }
 0x3e7   :  { %323 = vst [vmem:[#allocation8] sm:$0x3] %v322_v28 }
 0x3e8   :  { %501 = shalt.err (!%p498_p10)
}
 0x3e9   :  { %346 = dma.vmem_to_hbm [thread:$0]  %s344_s14, 32, %s615_s4, [#allocation4]  }
 0x3ea   :  { %514 = dma.done.wait [#allocation4], 32  }
 0x3eb   :  { %515 = vsyncadd [#allocation4], 4294967264 }
 0x3ec   :  { %516 = dma.done.wait [#allocation10], 32  }
 0x3ed   :  { %517 = vsyncadd [#allocation10], 4294967264 }
 0x3ee   :  { %363 = vsyncpa [#allocation3], 1 }
 0x3ef   :  { %364 = vsyncpa [#allocation6], 1 }
 0x3f0   :  { %365 = vsyncpa [#allocation4], 1 }
 0x3f1   :  { %366 = vsyncpa [#allocation10], 1 }

</bundles_post_ra>
